<compile_context>
chip_gen: v7x
topology: tpu7x:2x2x1
jax: 0.10.0
libtpu: 0.0.40
codegen_flags: <defaults>
</compile_context>

<pallas_src>
import functools

import jax
import jax.numpy as jnp
from jax import lax
from jax.experimental import pallas as pl
from jax.experimental.pallas import tpu as pltpu


# ----------------------------------------------------------------------------
# Kernel: one (pair, time-slab) grid cell. Carries (h, c) in VMEM scratch
# across the time axis; writes only the final hidden state (matches
# `_, (h_n, _) = lstm(x)` of the PyTorch module).
# ----------------------------------------------------------------------------
def _lstm_last_hidden_kernel(x_ref, wih_ref, whh_ref, b_ref, h_out_ref,
                             h_sc, c_sc, *, block_seq, hidden):
    # x_ref:    (block_seq, BP, D) f32, time-major slab (leading-axis per-step slice)
    # wih_ref:  (D, GP)            f32, gates packed [i|f|g|o] into one lane block
    # whh_ref:  (H, GP)            f32
    # b_ref:    (1, GP)            f32, b_ih + b_hh
    # h_out_ref:(BP, H)            f32, final hidden state of this stack
    # h_sc/c_sc:(BP, H)            f32 VMEM scratch, carried across the time axis
    H = hidden
    t_id = pl.program_id(1)                      # time axis (axis 0 = pair stack)

    # (Re-)initialise the carried state at the first time slab of EACH stack.
    @pl.when(t_id == 0)
    def _init():
        h_sc[...] = jnp.zeros_like(h_sc)
        c_sc[...] = jnp.zeros_like(c_sc)

    w_row = wih_ref[...]                         # (D, GP): 1 vreg when D == 1
    bias = b_ref[...]                            # (1, GP)
    d_in = x_ref.shape[-1]

    def step(t, carry):
        h, c = carry
        x_t = x_ref[t]                           # (BP, D) tile-aligned slice
        if d_in == 1:
            # D == 1: input projection is a VPU broadcast multiply-add; keeps
            # the degenerate K=1 matmul off the MXU entirely.
            g_x = x_t * w_row + bias             # (BP,1)*(1,GP) -> (BP,GP)
        else:
            # TODO(synk): for wide inputs hoist this projection out of the
            # recurrence (one batched matmul per slab, bf16 operands).
            g_x = jnp.dot(x_t, w_row, preferred_element_type=jnp.float32) + bias

        # Only the truly sequential part touches the MXU; the weight is
        # streamed from VMEM each step (not held live in vregs).
        gates = g_x + jnp.dot(h, whh_ref[...],
                              preferred_element_type=jnp.float32)  # (BP, GP)

        # All four gates live in lanes [0, 4H) of one lane block -> whole-vreg
        # activations (1 sigmoid + 1 tanh EUP pass). Padded lanes never read.
        sig = jax.nn.sigmoid(gates)
        tnh = jnp.tanh(gates)
        i = sig[:, 0 * H:1 * H]
        f = sig[:, 1 * H:2 * H]
        g = tnh[:, 2 * H:3 * H]
        o = sig[:, 3 * H:4 * H]
        c = f * c + i * g
        h = o * jnp.tanh(c)
        return h, c

    h, c = lax.fori_loop(0, block_seq, step, (h_sc[...], c_sc[...]),
                         unroll=min(8, block_seq))
    h_sc[...] = h
    c_sc[...] = c

    @pl.when(t_id == pl.num_programs(1) - 1)
    def _finalize():
        h_out_ref[...] = h.astype(h_out_ref.dtype)


# ----------------------------------------------------------------------------
# Fused wrapper: one pallas_call for both encoder applications (weights loaded
# once; pair axis is grid-parallel -> 2 TensorCores on v7x).
# ----------------------------------------------------------------------------
@functools.partial(jax.jit, static_argnames=("block_seq",))
def _contrastive_forward(x_i, x_j, w_ih, w_hh, b_ih, b_hh, *, block_seq):
    B, S, D = x_i.shape
    H = w_hh.shape[1]
    GP = 128 * pl.cdiv(4 * H, 128)   # all gates packed into aligned lane block(s)
    BP = 8 * pl.cdiv(B, 8)           # sublane-pad the per-stack batch
    assert S % block_seq == 0, "pad S or pick block_seq dividing S"

    # Leading pair axis (x_i | x_j), time-major, batch rows padded to a full
    # sublane group. Padded rows/lanes are mathematically inert and sliced off.
    # TODO(synk): for production feature widths keep x time-major upstream (or
    # fold this transform into the index_map) to avoid the wrapper transpose.
    x_pair = jnp.stack([x_i, x_j], axis=0).astype(jnp.float32)   # (2, B, S, D)
    x_pair = jnp.transpose(x_pair, (0, 2, 1, 3))                 # (2, S, B, D)
    x_pair = jnp.pad(x_pair, ((0, 0), (0, 0), (0, BP - B), (0, 0)))

    # Weights pre-transposed to (in, 4H), PyTorch gate order [i, f, g, o],
    # packed contiguously and lane-padded to GP; both LSTM biases pre-summed.
    # Kept f32: at H=16 the recurrent matmul is trivial and f32 avoids bf16
    # rounding compounding over long sequences (cast to bf16 when H scales).
    w_ih_p = jnp.zeros((D, GP), jnp.float32).at[:, :4 * H].set(w_ih.T)
    w_hh_p = jnp.zeros((H, GP), jnp.float32).at[:, :4 * H].set(w_hh.T)
    b_p = jnp.zeros((1, GP), jnp.float32).at[:, :4 * H].set((b_ih + b_hh)[None, :])

    kernel = functools.partial(_lstm_last_hidden_kernel,
                               block_seq=block_seq, hidden=H)

    h_all = pl.pallas_call(
        kernel,
        out_shape=jax.ShapeDtypeStruct((2, BP, H), jnp.float32),
        grid_spec=pltpu.PrefetchScalarGridSpec(
            num_scalar_prefetch=0,
            grid=(2, S // block_seq),        # (pair stack, time slabs)
            in_specs=[
                pl.BlockSpec((None, block_seq, BP, D), lambda p, s: (p, s, 0, 0)),
                pl.BlockSpec((D, GP), lambda p, s: (0, 0)),
                pl.BlockSpec((H, GP), lambda p, s: (0, 0)),
                pl.BlockSpec((1, GP), lambda p, s: (0, 0)),
            ],
            out_specs=pl.BlockSpec((None, BP, H), lambda p, s: (p, 0, 0)),
            scratch_shapes=[pltpu.VMEM((BP, H), jnp.float32),   # h carry
                            pltpu.VMEM((BP, H), jnp.float32)],  # c carry
        ),
        compiler_params=pltpu.CompilerParams(
            # Pair axis is independent work -> shard across TensorCores (v7x);
            # time axis carries h/c and must stay sequential.
            dimension_semantics=("parallel", "arbitrary"),
            vmem_limit_bytes=32 * 1024 * 1024,
        ),
    )(x_pair, w_ih_p, w_hh_p, b_p)

    return h_all[0, :B], h_all[1, :B]


def contrastive_model_forward(x_i, x_j, params, *, block_seq=None):
    S = x_i.shape[1]
    if block_seq is None:
        # Large time slabs amortise the ~0.35 us per-grid-step overhead; cap
        # the slab length and keep it a divisor of S.
        block_seq = S if S <= 128 else max(d for d in range(1, 129) if S % d == 0)
    return _contrastive_forward(x_i, x_j, *params, block_seq=block_seq)


# ----------------------------------------------------------------------------
# Pure-JAX reference (mirrors torch.nn.LSTM semantics) for validation
# ----------------------------------------------------------------------------
def lstm_ref(x, w_ih, w_hh, b_ih, b_hh):
    B, S, D = x.shape
    H = w_hh.shape[1]

    def step(carry, x_t):
        h, c = carry
        gates = x_t @ w_ih.T + b_ih + h @ w_hh.T + b_hh
        i, f, g, o = jnp.split(gates, 4, axis=-1)
        i, f, o = jax.nn.sigmoid(i), jax.nn.sigmoid(f), jax.nn.sigmoid(o)
        g = jnp.tanh(g)
        c = f * c + i * g
        h = o * jnp.tanh(c)
        return (h, c), None

    (h, _), _ = lax.scan(
        step,
        (jnp.zeros((B, H), jnp.float32), jnp.zeros((B, H), jnp.float32)),
        jnp.transpose(x, (1, 0, 2)),
    )
    return h


if __name__ == "__main__":
    # Module config: TimeSeriesEncoder(input_dim=1, hidden_dim=16)
    INPUT_DIM = 1
    HIDDEN_DIM = 16
    BATCH = 2
    SEQ = 8

    key = jax.random.PRNGKey(0)
    k_xi, k_xj, k_wih, k_whh, k_bih, k_bhh = jax.random.split(key, 6)

    # PyTorch-style U(-1/sqrt(H), 1/sqrt(H)) parameter init.
    bound = 1.0 / jnp.sqrt(jnp.float32(HIDDEN_DIM))
    w_ih = jax.random.uniform(k_wih, (4 * HIDDEN_DIM, INPUT_DIM),
                              jnp.float32, -bound, bound)
    w_hh = jax.random.uniform(k_whh, (4 * HIDDEN_DIM, HIDDEN_DIM),
                              jnp.float32, -bound, bound)
    b_ih = jax.random.uniform(k_bih, (4 * HIDDEN_DIM,), jnp.float32, -bound, bound)
    b_hh = jax.random.uniform(k_bhh, (4 * HIDDEN_DIM,), jnp.float32, -bound, bound)
    params = (w_ih, w_hh, b_ih, b_hh)

    # (batch, seq, input_dim), batch_first like the PyTorch model.
    x_i = jax.random.normal(k_xi, (BATCH, SEQ, INPUT_DIM), jnp.float32)
    x_j = jax.random.normal(k_xj, (BATCH, SEQ, INPUT_DIM), jnp.float32)

    h_i, h_j = contrastive_model_forward(x_i, x_j, params)
    jax.block_until_ready((h_i, h_j))

    # Validate against the pure-JAX f32 LSTM reference.
    ref_i = lstm_ref(x_i, *params)
    ref_j = lstm_ref(x_j, *params)
    assert h_i.shape == (BATCH, HIDDEN_DIM) and h_j.shape == (BATCH, HIDDEN_DIM)
    err_i = jnp.max(jnp.abs(h_i - ref_i))
    err_j = jnp.max(jnp.abs(h_j - ref_j))
    assert jnp.allclose(h_i, ref_i, atol=2e-2, rtol=2e-2), f"max err {err_i}"
    assert jnp.allclose(h_j, ref_j, atol=2e-2, rtol=2e-2), f"max err {err_j}"
    print("KERNEL_OK")
</pallas_src>

<mosaic_0001>
module attributes {stable_mosaic.version = 11 : i64} {
  func.func @_lstm_last_hidden_kernel(%arg0: i32, %arg1: i32, %arg2: memref<1x8x8x1xf32, #tpu.memory_space<vmem>>, %arg3: memref<1x128xf32, #tpu.memory_space<vmem>>, %arg4: memref<16x128xf32, #tpu.memory_space<vmem>>, %arg5: memref<1x128xf32, #tpu.memory_space<vmem>>, %arg6: memref<1x8x16xf32, #tpu.memory_space<vmem>>, %arg7: memref<8x16xf32, #tpu.memory_space<vmem>>, %arg8: memref<8x16xf32, #tpu.memory_space<vmem>>) attributes {dimension_semantics = [#tpu.dimension_semantics<parallel>, #tpu.dimension_semantics<arbitrary>], iteration_bounds = array<i64: 2, 1>, scalar_prefetch = 0 : i64, scratch_operands = 2 : i64, tpu.core_type = #tpu.core_type<tc>, window_params = [{transform_indices = @transform_0, window_bounds = array<i64: 1, 8, 8, 1>}, {pipeline_mode = #tpu.pipeline_mode<synchronous>, transform_indices = @transform_1, window_bounds = array<i64: 1, 128>}, {pipeline_mode = #tpu.pipeline_mode<synchronous>, transform_indices = @transform_2, window_bounds = array<i64: 16, 128>}, {pipeline_mode = #tpu.pipeline_mode<synchronous>, transform_indices = @transform_3, window_bounds = array<i64: 1, 128>}, {transform_indices = @transform_4, window_bounds = array<i64: 1, 8, 16>}]} {
    %c0_i32 = arith.constant 0 : i32
    %0 = arith.cmpi eq, %arg1, %c0_i32 : i32
    %1 = arith.extui %0 : i1 to i32
    %c0_i32_0 = arith.constant 0 : i32
    %2 = arith.cmpi ne, %1, %c0_i32_0 : i32
    scf.if %2 {
      %cst_70 = arith.constant 0.000000e+00 : f32
      %220 = vector.broadcast %cst_70 : f32 to vector<8x16xf32>
      %c0_71 = arith.constant 0 : index
      %c0_72 = arith.constant 0 : index
      %221 = vector.load %arg7[%c0_71, %c0_72] : memref<8x16xf32, #tpu.memory_space<vmem>>, vector<8x16xf32>
      tpu.vector_store %arg7[%c0_71, %c0_72], %220 {strides = array<i32>} : memref<8x16xf32, #tpu.memory_space<vmem>>, vector<8x16xf32>,
      %cst_73 = arith.constant 0.000000e+00 : f32
      %222 = vector.broadcast %cst_73 : f32 to vector<8x16xf32>
      %c0_74 = arith.constant 0 : index
      %c0_75 = arith.constant 0 : index
      %223 = vector.load %arg8[%c0_74, %c0_75] : memref<8x16xf32, #tpu.memory_space<vmem>>, vector<8x16xf32>
      tpu.vector_store %arg8[%c0_74, %c0_75], %222 {strides = array<i32>} : memref<8x16xf32, #tpu.memory_space<vmem>>, vector<8x16xf32>,
    } else {
    }
    %c0 = arith.constant 0 : index
    %c0_1 = arith.constant 0 : index
    %3 = vector.load %arg3[%c0, %c0_1] : memref<1x128xf32, #tpu.memory_space<vmem>>, vector<1x128xf32>
    %c0_2 = arith.constant 0 : index
    %c0_3 = arith.constant 0 : index
    %4 = vector.load %arg5[%c0_2, %c0_3] : memref<1x128xf32, #tpu.memory_space<vmem>>, vector<1x128xf32>
    %c0_4 = arith.constant 0 : index
    %c0_5 = arith.constant 0 : index
    %5 = vector.load %arg7[%c0_4, %c0_5] : memref<8x16xf32, #tpu.memory_space<vmem>>, vector<8x16xf32>
    %c0_6 = arith.constant 0 : index
    %c0_7 = arith.constant 0 : index
    %6 = vector.load %arg8[%c0_6, %c0_7] : memref<8x16xf32, #tpu.memory_space<vmem>>, vector<8x16xf32>
    %c0_i32_8 = arith.constant 0 : i32
    %c0_9 = arith.constant 0 : index
    %7 = arith.index_cast %c0_i32_8 : i32 to index
    %c0_10 = arith.constant 0 : index
    %c0_11 = arith.constant 0 : index
    %8 = vector.load %arg2[%c0_9, %7, %c0_10, %c0_11] : memref<1x8x8x1xf32, #tpu.memory_space<vmem>>, vector<1x1x8x1xf32>
    %9 = vector.shape_cast %8 : vector<1x1x8x1xf32> to vector<8x1xf32>
    %10 = vector.broadcast %9 : vector<8x1xf32> to vector<8x128xf32>
    %11 = vector.broadcast %3 : vector<1x128xf32> to vector<8x128xf32>
    %12 = arith.mulf %10, %11 : vector<8x128xf32>
    %13 = vector.broadcast %4 : vector<1x128xf32> to vector<8x128xf32>
    %14 = arith.addf %12, %13 : vector<8x128xf32>
    %c0_12 = arith.constant 0 : index
    %c0_13 = arith.constant 0 : index
    %15 = vector.load %arg4[%c0_12, %c0_13] : memref<16x128xf32, #tpu.memory_space<vmem>>, vector<16x128xf32>
    %cst = arith.constant dense<0.000000e+00> : vector<8x128xf32>
    %16 = tpu.matmul %5, %15, %cst {dimension_numbers = #tpu.dot_dimension_numbers<[1], [0], [0], [1], [0, 0, 1, 1], [], []>} : vector<8x16xf32>, vector<16x128xf32>, vector<8x128xf32> -> vector<8x128xf32>
    %17 = arith.addf %14, %16 : vector<8x128xf32>
    %18 = arith.negf %17 : vector<8x128xf32>
    %19 = math.exp %18 : vector<8x128xf32>
    %cst_14 = arith.constant 1.000000e+00 : f32
    %20 = vector.broadcast %cst_14 : f32 to vector<8x128xf32>
    %21 = arith.addf %20, %19 : vector<8x128xf32>
    %22 = arith.divf %20, %21 : vector<8x128xf32>
    %23 = math.tanh %17 : vector<8x128xf32>
    %24 = vector.extract_strided_slice %22 {offsets = [0, 0], sizes = [8, 16], strides = [1, 1]} : vector<8x128xf32> to vector<8x16xf32>
    %25 = vector.extract_strided_slice %22 {offsets = [0, 16], sizes = [8, 16], strides = [1, 1]} : vector<8x128xf32> to vector<8x16xf32>
    %26 = vector.extract_strided_slice %23 {offsets = [0, 32], sizes = [8, 16], strides = [1, 1]} : vector<8x128xf32> to vector<8x16xf32>
    %27 = vector.extract_strided_slice %22 {offsets = [0, 48], sizes = [8, 16], strides = [1, 1]} : vector<8x128xf32> to vector<8x16xf32>
    %28 = arith.mulf %25, %6 : vector<8x16xf32>
    %29 = arith.mulf %24, %26 : vector<8x16xf32>
    %30 = arith.addf %28, %29 : vector<8x16xf32>
    %31 = math.tanh %30 : vector<8x16xf32>
    %32 = arith.mulf %27, %31 : vector<8x16xf32>
    %c1_i32 = arith.constant 1 : i32
    %c0_15 = arith.constant 0 : index
    %33 = arith.index_cast %c1_i32 : i32 to index
    %c0_16 = arith.constant 0 : index
    %c0_17 = arith.constant 0 : index
    %34 = vector.load %arg2[%c0_15, %33, %c0_16, %c0_17] : memref<1x8x8x1xf32, #tpu.memory_space<vmem>>, vector<1x1x8x1xf32>
    %35 = vector.shape_cast %34 : vector<1x1x8x1xf32> to vector<8x1xf32>
    %36 = vector.broadcast %35 : vector<8x1xf32> to vector<8x128xf32>
    %37 = vector.broadcast %3 : vector<1x128xf32> to vector<8x128xf32>
    %38 = arith.mulf %36, %37 : vector<8x128xf32>
    %39 = vector.broadcast %4 : vector<1x128xf32> to vector<8x128xf32>
    %40 = arith.addf %38, %39 : vector<8x128xf32>
    %c0_18 = arith.constant 0 : index
    %c0_19 = arith.constant 0 : index
    %41 = vector.load %arg4[%c0_18, %c0_19] : memref<16x128xf32, #tpu.memory_space<vmem>>, vector<16x128xf32>
    %cst_20 = arith.constant dense<0.000000e+00> : vector<8x128xf32>
    %42 = tpu.matmul %32, %41, %cst_20 {dimension_numbers = #tpu.dot_dimension_numbers<[1], [0], [0], [1], [0, 0, 1, 1], [], []>} : vector<8x16xf32>, vector<16x128xf32>, vector<8x128xf32> -> vector<8x128xf32>
    %43 = arith.addf %40, %42 : vector<8x128xf32>
    %44 = arith.negf %43 : vector<8x128xf32>
    %45 = math.exp %44 : vector<8x128xf32>
    %cst_21 = arith.constant 1.000000e+00 : f32
    %46 = vector.broadcast %cst_21 : f32 to vector<8x128xf32>
    %47 = arith.addf %46, %45 : vector<8x128xf32>
    %48 = arith.divf %46, %47 : vector<8x128xf32>
    %49 = math.tanh %43 : vector<8x128xf32>
    %50 = vector.extract_strided_slice %48 {offsets = [0, 0], sizes = [8, 16], strides = [1, 1]} : vector<8x128xf32> to vector<8x16xf32>
    %51 = vector.extract_strided_slice %48 {offsets = [0, 16], sizes = [8, 16], strides = [1, 1]} : vector<8x128xf32> to vector<8x16xf32>
    %52 = vector.extract_strided_slice %49 {offsets = [0, 32], sizes = [8, 16], strides = [1, 1]} : vector<8x128xf32> to vector<8x16xf32>
    %53 = vector.extract_strided_slice %48 {offsets = [0, 48], sizes = [8, 16], strides = [1, 1]} : vector<8x128xf32> to vector<8x16xf32>
    %54 = arith.mulf %51, %30 : vector<8x16xf32>
    %55 = arith.mulf %50, %52 : vector<8x16xf32>
    %56 = arith.addf %54, %55 : vector<8x16xf32>
    %57 = math.tanh %56 : vector<8x16xf32>
    %58 = arith.mulf %53, %57 : vector<8x16xf32>
    %c2_i32 = arith.constant 2 : i32
    %c0_22 = arith.constant 0 : index
    %59 = arith.index_cast %c2_i32 : i32 to index
    %c0_23 = arith.constant 0 : index
    %c0_24 = arith.constant 0 : index
    %60 = vector.load %arg2[%c0_22, %59, %c0_23, %c0_24] : memref<1x8x8x1xf32, #tpu.memory_space<vmem>>, vector<1x1x8x1xf32>
    %61 = vector.shape_cast %60 : vector<1x1x8x1xf32> to vector<8x1xf32>
    %62 = vector.broadcast %61 : vector<8x1xf32> to vector<8x128xf32>
    %63 = vector.broadcast %3 : vector<1x128xf32> to vector<8x128xf32>
    %64 = arith.mulf %62, %63 : vector<8x128xf32>
    %65 = vector.broadcast %4 : vector<1x128xf32> to vector<8x128xf32>
    %66 = arith.addf %64, %65 : vector<8x128xf32>
    %c0_25 = arith.constant 0 : index
    %c0_26 = arith.constant 0 : index
    %67 = vector.load %arg4[%c0_25, %c0_26] : memref<16x128xf32, #tpu.memory_space<vmem>>, vector<16x128xf32>
    %cst_27 = arith.constant dense<0.000000e+00> : vector<8x128xf32>
    %68 = tpu.matmul %58, %67, %cst_27 {dimension_numbers = #tpu.dot_dimension_numbers<[1], [0], [0], [1], [0, 0, 1, 1], [], []>} : vector<8x16xf32>, vector<16x128xf32>, vector<8x128xf32> -> vector<8x128xf32>
    %69 = arith.addf %66, %68 : vector<8x128xf32>
    %70 = arith.negf %69 : vector<8x128xf32>
    %71 = math.exp %70 : vector<8x128xf32>
    %cst_28 = arith.constant 1.000000e+00 : f32
    %72 = vector.broadcast %cst_28 : f32 to vector<8x128xf32>
    %73 = arith.addf %72, %71 : vector<8x128xf32>
    %74 = arith.divf %72, %73 : vector<8x128xf32>
    %75 = math.tanh %69 : vector<8x128xf32>
    %76 = vector.extract_strided_slice %74 {offsets = [0, 0], sizes = [8, 16], strides = [1, 1]} : vector<8x128xf32> to vector<8x16xf32>
    %77 = vector.extract_strided_slice %74 {offsets = [0, 16], sizes = [8, 16], strides = [1, 1]} : vector<8x128xf32> to vector<8x16xf32>
    %78 = vector.extract_strided_slice %75 {offsets = [0, 32], sizes = [8, 16], strides = [1, 1]} : vector<8x128xf32> to vector<8x16xf32>
    %79 = vector.extract_strided_slice %74 {offsets = [0, 48], sizes = [8, 16], strides = [1, 1]} : vector<8x128xf32> to vector<8x16xf32>
    %80 = arith.mulf %77, %56 : vector<8x16xf32>
    %81 = arith.mulf %76, %78 : vector<8x16xf32>
    %82 = arith.addf %80, %81 : vector<8x16xf32>
    %83 = math.tanh %82 : vector<8x16xf32>
    %84 = arith.mulf %79, %83 : vector<8x16xf32>
    %c3_i32 = arith.constant 3 : i32
    %c0_29 = arith.constant 0 : index
    %85 = arith.index_cast %c3_i32 : i32 to index
    %c0_30 = arith.constant 0 : index
    %c0_31 = arith.constant 0 : index
    %86 = vector.load %arg2[%c0_29, %85, %c0_30, %c0_31] : memref<1x8x8x1xf32, #tpu.memory_space<vmem>>, vector<1x1x8x1xf32>
    %87 = vector.shape_cast %86 : vector<1x1x8x1xf32> to vector<8x1xf32>
    %88 = vector.broadcast %87 : vector<8x1xf32> to vector<8x128xf32>
    %89 = vector.broadcast %3 : vector<1x128xf32> to vector<8x128xf32>
    %90 = arith.mulf %88, %89 : vector<8x128xf32>
    %91 = vector.broadcast %4 : vector<1x128xf32> to vector<8x128xf32>
    %92 = arith.addf %90, %91 : vector<8x128xf32>
    %c0_32 = arith.constant 0 : index
    %c0_33 = arith.constant 0 : index
    %93 = vector.load %arg4[%c0_32, %c0_33] : memref<16x128xf32, #tpu.memory_space<vmem>>, vector<16x128xf32>
    %cst_34 = arith.constant dense<0.000000e+00> : vector<8x128xf32>
    %94 = tpu.matmul %84, %93, %cst_34 {dimension_numbers = #tpu.dot_dimension_numbers<[1], [0], [0], [1], [0, 0, 1, 1], [], []>} : vector<8x16xf32>, vector<16x128xf32>, vector<8x128xf32> -> vector<8x128xf32>
    %95 = arith.addf %92, %94 : vector<8x128xf32>
    %96 = arith.negf %95 : vector<8x128xf32>
    %97 = math.exp %96 : vector<8x128xf32>
    %cst_35 = arith.constant 1.000000e+00 : f32
    %98 = vector.broadcast %cst_35 : f32 to vector<8x128xf32>
    %99 = arith.addf %98, %97 : vector<8x128xf32>
    %100 = arith.divf %98, %99 : vector<8x128xf32>
    %101 = math.tanh %95 : vector<8x128xf32>
    %102 = vector.extract_strided_slice %100 {offsets = [0, 0], sizes = [8, 16], strides = [1, 1]} : vector<8x128xf32> to vector<8x16xf32>
    %103 = vector.extract_strided_slice %100 {offsets = [0, 16], sizes = [8, 16], strides = [1, 1]} : vector<8x128xf32> to vector<8x16xf32>
    %104 = vector.extract_strided_slice %101 {offsets = [0, 32], sizes = [8, 16], strides = [1, 1]} : vector<8x128xf32> to vector<8x16xf32>
    %105 = vector.extract_strided_slice %100 {offsets = [0, 48], sizes = [8, 16], strides = [1, 1]} : vector<8x128xf32> to vector<8x16xf32>
    %106 = arith.mulf %103, %82 : vector<8x16xf32>
    %107 = arith.mulf %102, %104 : vector<8x16xf32>
    %108 = arith.addf %106, %107 : vector<8x16xf32>
    %109 = math.tanh %108 : vector<8x16xf32>
    %110 = arith.mulf %105, %109 : vector<8x16xf32>
    %c4_i32 = arith.constant 4 : i32
    %c0_36 = arith.constant 0 : index
    %111 = arith.index_cast %c4_i32 : i32 to index
    %c0_37 = arith.constant 0 : index
    %c0_38 = arith.constant 0 : index
    %112 = vector.load %arg2[%c0_36, %111, %c0_37, %c0_38] : memref<1x8x8x1xf32, #tpu.memory_space<vmem>>, vector<1x1x8x1xf32>
    %113 = vector.shape_cast %112 : vector<1x1x8x1xf32> to vector<8x1xf32>
    %114 = vector.broadcast %113 : vector<8x1xf32> to vector<8x128xf32>
    %115 = vector.broadcast %3 : vector<1x128xf32> to vector<8x128xf32>
    %116 = arith.mulf %114, %115 : vector<8x128xf32>
    %117 = vector.broadcast %4 : vector<1x128xf32> to vector<8x128xf32>
    %118 = arith.addf %116, %117 : vector<8x128xf32>
    %c0_39 = arith.constant 0 : index
    %c0_40 = arith.constant 0 : index
    %119 = vector.load %arg4[%c0_39, %c0_40] : memref<16x128xf32, #tpu.memory_space<vmem>>, vector<16x128xf32>
    %cst_41 = arith.constant dense<0.000000e+00> : vector<8x128xf32>
    %120 = tpu.matmul %110, %119, %cst_41 {dimension_numbers = #tpu.dot_dimension_numbers<[1], [0], [0], [1], [0, 0, 1, 1], [], []>} : vector<8x16xf32>, vector<16x128xf32>, vector<8x128xf32> -> vector<8x128xf32>
    %121 = arith.addf %118, %120 : vector<8x128xf32>
    %122 = arith.negf %121 : vector<8x128xf32>
    %123 = math.exp %122 : vector<8x128xf32>
    %cst_42 = arith.constant 1.000000e+00 : f32
    %124 = vector.broadcast %cst_42 : f32 to vector<8x128xf32>
    %125 = arith.addf %124, %123 : vector<8x128xf32>
    %126 = arith.divf %124, %125 : vector<8x128xf32>
    %127 = math.tanh %121 : vector<8x128xf32>
    %128 = vector.extract_strided_slice %126 {offsets = [0, 0], sizes = [8, 16], strides = [1, 1]} : vector<8x128xf32> to vector<8x16xf32>
    %129 = vector.extract_strided_slice %126 {offsets = [0, 16], sizes = [8, 16], strides = [1, 1]} : vector<8x128xf32> to vector<8x16xf32>
    %130 = vector.extract_strided_slice %127 {offsets = [0, 32], sizes = [8, 16], strides = [1, 1]} : vector<8x128xf32> to vector<8x16xf32>
    %131 = vector.extract_strided_slice %126 {offsets = [0, 48], sizes = [8, 16], strides = [1, 1]} : vector<8x128xf32> to vector<8x16xf32>
    %132 = arith.mulf %129, %108 : vector<8x16xf32>
    %133 = arith.mulf %128, %130 : vector<8x16xf32>
    %134 = arith.addf %132, %133 : vector<8x16xf32>
    %135 = math.tanh %134 : vector<8x16xf32>
    %136 = arith.mulf %131, %135 : vector<8x16xf32>
    %c5_i32 = arith.constant 5 : i32
    %c0_43 = arith.constant 0 : index
    %137 = arith.index_cast %c5_i32 : i32 to index
    %c0_44 = arith.constant 0 : index
    %c0_45 = arith.constant 0 : index
    %138 = vector.load %arg2[%c0_43, %137, %c0_44, %c0_45] : memref<1x8x8x1xf32, #tpu.memory_space<vmem>>, vector<1x1x8x1xf32>
    %139 = vector.shape_cast %138 : vector<1x1x8x1xf32> to vector<8x1xf32>
    %140 = vector.broadcast %139 : vector<8x1xf32> to vector<8x128xf32>
    %141 = vector.broadcast %3 : vector<1x128xf32> to vector<8x128xf32>
    %142 = arith.mulf %140, %141 : vector<8x128xf32>
    %143 = vector.broadcast %4 : vector<1x128xf32> to vector<8x128xf32>
    %144 = arith.addf %142, %143 : vector<8x128xf32>
    %c0_46 = arith.constant 0 : index
    %c0_47 = arith.constant 0 : index
    %145 = vector.load %arg4[%c0_46, %c0_47] : memref<16x128xf32, #tpu.memory_space<vmem>>, vector<16x128xf32>
    %cst_48 = arith.constant dense<0.000000e+00> : vector<8x128xf32>
    %146 = tpu.matmul %136, %145, %cst_48 {dimension_numbers = #tpu.dot_dimension_numbers<[1], [0], [0], [1], [0, 0, 1, 1], [], []>} : vector<8x16xf32>, vector<16x128xf32>, vector<8x128xf32> -> vector<8x128xf32>
    %147 = arith.addf %144, %146 : vector<8x128xf32>
    %148 = arith.negf %147 : vector<8x128xf32>
    %149 = math.exp %148 : vector<8x128xf32>
    %cst_49 = arith.constant 1.000000e+00 : f32
    %150 = vector.broadcast %cst_49 : f32 to vector<8x128xf32>
    %151 = arith.addf %150, %149 : vector<8x128xf32>
    %152 = arith.divf %150, %151 : vector<8x128xf32>
    %153 = math.tanh %147 : vector<8x128xf32>
    %154 = vector.extract_strided_slice %152 {offsets = [0, 0], sizes = [8, 16], strides = [1, 1]} : vector<8x128xf32> to vector<8x16xf32>
    %155 = vector.extract_strided_slice %152 {offsets = [0, 16], sizes = [8, 16], strides = [1, 1]} : vector<8x128xf32> to vector<8x16xf32>
    %156 = vector.extract_strided_slice %153 {offsets = [0, 32], sizes = [8, 16], strides = [1, 1]} : vector<8x128xf32> to vector<8x16xf32>
    %157 = vector.extract_strided_slice %152 {offsets = [0, 48], sizes = [8, 16], strides = [1, 1]} : vector<8x128xf32> to vector<8x16xf32>
    %158 = arith.mulf %155, %134 : vector<8x16xf32>
    %159 = arith.mulf %154, %156 : vector<8x16xf32>
    %160 = arith.addf %158, %159 : vector<8x16xf32>
    %161 = math.tanh %160 : vector<8x16xf32>
    %162 = arith.mulf %157, %161 : vector<8x16xf32>
    %c6_i32 = arith.constant 6 : i32
    %c0_50 = arith.constant 0 : index
    %163 = arith.index_cast %c6_i32 : i32 to index
    %c0_51 = arith.constant 0 : index
    %c0_52 = arith.constant 0 : index
    %164 = vector.load %arg2[%c0_50, %163, %c0_51, %c0_52] : memref<1x8x8x1xf32, #tpu.memory_space<vmem>>, vector<1x1x8x1xf32>
    %165 = vector.shape_cast %164 : vector<1x1x8x1xf32> to vector<8x1xf32>
    %166 = vector.broadcast %165 : vector<8x1xf32> to vector<8x128xf32>
    %167 = vector.broadcast %3 : vector<1x128xf32> to vector<8x128xf32>
    %168 = arith.mulf %166, %167 : vector<8x128xf32>
    %169 = vector.broadcast %4 : vector<1x128xf32> to vector<8x128xf32>
    %170 = arith.addf %168, %169 : vector<8x128xf32>
    %c0_53 = arith.constant 0 : index
    %c0_54 = arith.constant 0 : index
    %171 = vector.load %arg4[%c0_53, %c0_54] : memref<16x128xf32, #tpu.memory_space<vmem>>, vector<16x128xf32>
    %cst_55 = arith.constant dense<0.000000e+00> : vector<8x128xf32>
    %172 = tpu.matmul %162, %171, %cst_55 {dimension_numbers = #tpu.dot_dimension_numbers<[1], [0], [0], [1], [0, 0, 1, 1], [], []>} : vector<8x16xf32>, vector<16x128xf32>, vector<8x128xf32> -> vector<8x128xf32>
    %173 = arith.addf %170, %172 : vector<8x128xf32>
    %174 = arith.negf %173 : vector<8x128xf32>
    %175 = math.exp %174 : vector<8x128xf32>
    %cst_56 = arith.constant 1.000000e+00 : f32
    %176 = vector.broadcast %cst_56 : f32 to vector<8x128xf32>
    %177 = arith.addf %176, %175 : vector<8x128xf32>
    %178 = arith.divf %176, %177 : vector<8x128xf32>
    %179 = math.tanh %173 : vector<8x128xf32>
    %180 = vector.extract_strided_slice %178 {offsets = [0, 0], sizes = [8, 16], strides = [1, 1]} : vector<8x128xf32> to vector<8x16xf32>
    %181 = vector.extract_strided_slice %178 {offsets = [0, 16], sizes = [8, 16], strides = [1, 1]} : vector<8x128xf32> to vector<8x16xf32>
    %182 = vector.extract_strided_slice %179 {offsets = [0, 32], sizes = [8, 16], strides = [1, 1]} : vector<8x128xf32> to vector<8x16xf32>
    %183 = vector.extract_strided_slice %178 {offsets = [0, 48], sizes = [8, 16], strides = [1, 1]} : vector<8x128xf32> to vector<8x16xf32>
    %184 = arith.mulf %181, %160 : vector<8x16xf32>
    %185 = arith.mulf %180, %182 : vector<8x16xf32>
    %186 = arith.addf %184, %185 : vector<8x16xf32>
    %187 = math.tanh %186 : vector<8x16xf32>
    %188 = arith.mulf %183, %187 : vector<8x16xf32>
    %c7_i32 = arith.constant 7 : i32
    %c0_57 = arith.constant 0 : index
    %189 = arith.index_cast %c7_i32 : i32 to index
    %c0_58 = arith.constant 0 : index
    %c0_59 = arith.constant 0 : index
    %190 = vector.load %arg2[%c0_57, %189, %c0_58, %c0_59] : memref<1x8x8x1xf32, #tpu.memory_space<vmem>>, vector<1x1x8x1xf32>
    %191 = vector.shape_cast %190 : vector<1x1x8x1xf32> to vector<8x1xf32>
    %192 = vector.broadcast %191 : vector<8x1xf32> to vector<8x128xf32>
    %193 = vector.broadcast %3 : vector<1x128xf32> to vector<8x128xf32>
    %194 = arith.mulf %192, %193 : vector<8x128xf32>
    %195 = vector.broadcast %4 : vector<1x128xf32> to vector<8x128xf32>
    %196 = arith.addf %194, %195 : vector<8x128xf32>
    %c0_60 = arith.constant 0 : index
    %c0_61 = arith.constant 0 : index
    %197 = vector.load %arg4[%c0_60, %c0_61] : memref<16x128xf32, #tpu.memory_space<vmem>>, vector<16x128xf32>
    %cst_62 = arith.constant dense<0.000000e+00> : vector<8x128xf32>
    %198 = tpu.matmul %188, %197, %cst_62 {dimension_numbers = #tpu.dot_dimension_numbers<[1], [0], [0], [1], [0, 0, 1, 1], [], []>} : vector<8x16xf32>, vector<16x128xf32>, vector<8x128xf32> -> vector<8x128xf32>
    %199 = arith.addf %196, %198 : vector<8x128xf32>
    %200 = arith.negf %199 : vector<8x128xf32>
    %201 = math.exp %200 : vector<8x128xf32>
    %cst_63 = arith.constant 1.000000e+00 : f32
    %202 = vector.broadcast %cst_63 : f32 to vector<8x128xf32>
    %203 = arith.addf %202, %201 : vector<8x128xf32>
    %204 = arith.divf %202, %203 : vector<8x128xf32>
    %205 = math.tanh %199 : vector<8x128xf32>
    %206 = vector.extract_strided_slice %204 {offsets = [0, 0], sizes = [8, 16], strides = [1, 1]} : vector<8x128xf32> to vector<8x16xf32>
    %207 = vector.extract_strided_slice %204 {offsets = [0, 16], sizes = [8, 16], strides = [1, 1]} : vector<8x128xf32> to vector<8x16xf32>
    %208 = vector.extract_strided_slice %205 {offsets = [0, 32], sizes = [8, 16], strides = [1, 1]} : vector<8x128xf32> to vector<8x16xf32>
    %209 = vector.extract_strided_slice %204 {offsets = [0, 48], sizes = [8, 16], strides = [1, 1]} : vector<8x128xf32> to vector<8x16xf32>
    %210 = arith.mulf %207, %186 : vector<8x16xf32>
    %211 = arith.mulf %206, %208 : vector<8x16xf32>
    %212 = arith.addf %210, %211 : vector<8x16xf32>
    %213 = math.tanh %212 : vector<8x16xf32>
    %214 = arith.mulf %209, %213 : vector<8x16xf32>
    %c8_i32 = arith.constant 8 : i32
    %c0_64 = arith.constant 0 : index
    %c0_65 = arith.constant 0 : index
    %215 = vector.load %arg7[%c0_64, %c0_65] : memref<8x16xf32, #tpu.memory_space<vmem>>, vector<8x16xf32>
    tpu.vector_store %arg7[%c0_64, %c0_65], %214 {strides = array<i32>} : memref<8x16xf32, #tpu.memory_space<vmem>>, vector<8x16xf32>,
    %c0_66 = arith.constant 0 : index
    %c0_67 = arith.constant 0 : index
    %216 = vector.load %arg8[%c0_66, %c0_67] : memref<8x16xf32, #tpu.memory_space<vmem>>, vector<8x16xf32>
    tpu.vector_store %arg8[%c0_66, %c0_67], %212 {strides = array<i32>} : memref<8x16xf32, #tpu.memory_space<vmem>>, vector<8x16xf32>,
    %c0_i32_68 = arith.constant 0 : i32
    %217 = arith.cmpi eq, %arg1, %c0_i32_68 : i32
    %218 = arith.extui %217 : i1 to i32
    %c0_i32_69 = arith.constant 0 : i32
    %219 = arith.cmpi ne, %218, %c0_i32_69 : i32
    scf.if %219 {
      %c0_70 = arith.constant 0 : index
      %c0_71 = arith.constant 0 : index
      %c0_72 = arith.constant 0 : index
      %220 = vector.load %arg6[%c0_70, %c0_71, %c0_72] : memref<1x8x16xf32, #tpu.memory_space<vmem>>, vector<1x8x16xf32>
      %221 = vector.shape_cast %220 : vector<1x8x16xf32> to vector<8x16xf32>
      %222 = vector.shape_cast %214 : vector<8x16xf32> to vector<1x8x16xf32>
      tpu.vector_store %arg6[%c0_70, %c0_71, %c0_72], %222 {strides = array<i32>} : memref<1x8x16xf32, #tpu.memory_space<vmem>>, vector<1x8x16xf32>,
    } else {
    }
    return
  }
  func.func @transform_0(%arg0: i32, %arg1: i32) -> (i32, i32, i32, i32) {
    %c0_i32 = arith.constant 0 : i32
    %c0_i32_0 = arith.constant 0 : i32
    %c0_i32_1 = arith.constant 0 : i32
    return %arg0, %arg1, %c0_i32, %c0_i32_0 : i32, i32, i32, i32
  }
  func.func @transform_1(%arg0: i32, %arg1: i32) -> (i32, i32) {
    %c0_i32 = arith.constant 0 : i32
    %c0_i32_0 = arith.constant 0 : i32
    %c0_i32_1 = arith.constant 0 : i32
    return %c0_i32, %c0_i32_0 : i32, i32
  }
  func.func @transform_2(%arg0: i32, %arg1: i32) -> (i32, i32) {
    %c0_i32 = arith.constant 0 : i32
    %c0_i32_0 = arith.constant 0 : i32
    %c0_i32_1 = arith.constant 0 : i32
    return %c0_i32, %c0_i32_0 : i32, i32
  }
  func.func @transform_3(%arg0: i32, %arg1: i32) -> (i32, i32) {
    %c0_i32 = arith.constant 0 : i32
    %c0_i32_0 = arith.constant 0 : i32
    %c0_i32_1 = arith.constant 0 : i32
    return %c0_i32, %c0_i32_0 : i32, i32
  }
  func.func @transform_4(%arg0: i32, %arg1: i32) -> (i32, i32, i32) {
    %c0_i32 = arith.constant 0 : i32
    %c0_i32_0 = arith.constant 0 : i32
    %c0_i32_1 = arith.constant 0 : i32
    return %arg0, %c0_i32, %c0_i32_0 : i32, i32, i32
  }
}

</mosaic_0001>

<bundles_post_ra>
// kernel: _contrastive_forward.1
= control target key start
LH: loop header
LB: loop body
LE: loop exit
PB: predicated region body
PF: predicated region fallthrough
CT: control target
= control target key end

     0   :  { %s1501_s15 = smov 0   ;;  %s1503_s16 = smov 0   ;;  %s1662_s0 = inlined_call_operand.vmem [shape: f32[2,8,8,1], index: 0, kind: input, shape index: {}]   ;;  %s1663_s1 = inlined_call_operand.vmem [shape: f32[1,128], index: 1, kind: input, shape index: {}]   ;;  %s1664_s2 = inlined_call_operand.vmem [shape: f32[16,128], index: 2, kind: input, shape index: {}]   ;;  %s1665_s3 = inlined_call_operand.vmem [shape: f32[1,128], index: 3, kind: input, shape index: {}]   ;;  %s1666_s4 = inlined_call_operand.vmem [shape: f32[2,8,16], index: 4, kind: output, shape index: {}]  }
   0x1   :  { %s1505_s17 = smov 0  }
   0x2 LB: > { %s26_s18 = sadd.s32 1, %s1461_s16  ;;  %p1208_p0 = scmp.ge.s32.totalorder %s1465_s17, 1  ;;  %s1465_s17 = sphi %s1505_s17, %s14_s17   ;;  %s1461_s16 = sphi %s1503_s16, %s1668_s16   ;;  %s1457_s15 = sphi %s1501_s15, %s1667_s15  }
   0x3   : > { %p28_p1 = scmp.ge.s32.totalorder %s26_s18, 2  ;;  %p181_p2 = scmp.lt.s32.totalorder %s1465_s17, 3 }
   0x5   : > { %s1670_s18 = smov (%p28_p1, %s26_s18), 0  ;;  %p182_p3 = pnand %p1208_p0, %p181_p2 }
   0x6   : > { %v255_v0 = vld [vmem:[%s1664_s2] sm:$0xff] (!%p182_p3)  ;;  %v256_v1 = vld [vmem:[%s1664_s2 + $0x8] sm:$0xff] (!%p182_p3)  ;;  %vm228_vm0 = vcmask (!%p182_p3), 130048   ;;  %v1467_v2 = vmov (!%p182_p3), 0.0|0.0   ;;  %vm1468_vm1 = vmmov (!%p182_p3), 0   ;;  %v1469_v4 = vmov (!%p182_p3), 0.0  }
   0x7   : > { %185 = sbr.rel (%p182_p3) target bundleno = 5632 (0x1600), region = 36  ;;  %1320 = vmatprep.subr.bf16.mxu0 (!%p182_p3), %v1467_v2  ;;  %v1526_v3 = vpack.c.bf16 (!%p182_p3), %v256_v1, %v255_v0  ;;  %1268 = vmatprep.mubr.msk.f32.mxu0 (!%p182_p3), %vm1468_vm1, %v1469_v4  ;;  %229 = vst.msk [vmem:[#allocation2] sm:$0xff] (!%p182_p3), %vm228_vm0, %v1469_v4  ;;  %230 = vst.msk [vmem:[#allocation3] sm:$0xff] (!%p182_p3), %vm228_vm0, %v1469_v4  ;;  %p211_p4 = scmp.lt.s32.totalorder (!%p182_p3), %s1457_s15, 1  ;;  %v1470_v5 = vmov (!%p182_p3), 0  }
   0x8   : > { %1377 = vset.pattern.permute.xlu0 (!%p182_p3), %v1470_v5  ;;  %1323 = vmatprep.subr.bf16.mxu1 (!%p182_p3), %v1467_v2  ;;  %s1471_s27 = smov (!%p182_p3), 16   ;;  %v1559_v9 = vld [vmem:[%s1663_s1] ss:$0 sm:$0xff] (!%p182_p3)  ;;  %s1472_s6 = smov (!%p182_p3), 96  }
   0x9   : > { %1322 = vmatpush3.bf16.msra.mxu0 (!%p182_p3), %v1526_v3  ;;  %1325 = vmatpush3.bf16.msra.mxu1 (!%p182_p3), %v1526_v3  ;;  %v1565_v12 = vld [vmem:[%s1665_s3] ss:$0 sm:$0xff] (!%p182_p3)  ;;  %s1473_s7 = smov (!%p182_p3), 32   ;;  %s1474_s8 = smov (!%p182_p3), 80  }
   0xa   : > { %1275 = vmatprep.mubr.msk.f32.mxu1 (!%p182_p3), %vm1468_vm1, %v1469_v4  ;;  %1326 = vmatprep.subr.bf16.mxu0 (!%p182_p3), %v1467_v2  ;;  %s1475_s9 = smov (!%p182_p3), 112  }
   0xb   : > { %1378 = vset.pattern.permute.xlu1 (!%p182_p3), %v1470_v5  ;;  %1329 = vmatprep.subr.bf16.mxu1 (!%p182_p3), %v1467_v2 }
   0xe   : > { %s1672_s15 = smov (!%p211_p4, %s1457_s15), 1  ;;  %v233_v7 = vld [vmem:[#allocation2] sm:$0xff]  ;;  %v234_v8 = vld [vmem:[#allocation3] sm:$0xff] }
   0xf   : > { %s1239_s23 = sshll.u32 %s1672_s15, 6  ;;  %1269 = vmatmul.mubr.msk.f32.vlgmr.msra.gmra.mrb[0].mxu0 %vm228_vm0, %v233_v7  ;;  %340 = vrot.lane.b32.xlu1 %v234_v8, %s1471_s27  ;;  %s1211_s10 = sshll.u32 %s1672_s15, 3 }
  0x10   : > { %s1547_s26 = scalar_lea.vmem %s1662_s0, %s1239_s23  ;;  %1328 = vmatpush3.bf16.msra.mxu0 %v1526_v3  ;;  %1282 = vmatprep.mubr.msk.f32.mxu0 %vm1468_vm1, %v1469_v4  ;;  %s223_s13 = scalar_lea.vmem %s1666_s4, %s1211_s10 }
  0x11   : > { %v235_v6 = vld [vmem:[%s1547_s26] sm:$0xff]  ;;  %1332 = vmatprep.subr.bf16.mxu0 %v1467_v2  ;;  %v1216_v29 = vld [vmem:[%s1547_s26 + $0x8] sm:$0xff]  ;;  %v1219_v50 = vld [vmem:[%s1547_s26 + $0x10] sm:$0xff] }
  0x12   : > { %238 = vperm.xlu0 %1377, %v235_v6  }
  0x81   : > { %v341_v24 = vpop.permute.xlu1 %340 }
  0x91   : > { %v239_v10 = vpop.permute.xlu0 %238 }
  0x92   : > { %v247_v11 = vmul.f32 %v1559_v9, %v239_v10 }
  0x94   : > { %v254_v13 = vadd.f32 %v1565_v12, %v247_v11  ;;  %v1222_v11 = vld [vmem:[%s1547_s26 + $0x18] sm:$0xff] }
  0xe2   : > { %v327_v14 = vpop.f32.mrb[0].mxu0 }
  0xe3   : > { %v331_v15 = vadd.f32 %v327_v14, %v254_v13  ;;  %v1270_v16 = vpop.f32.mrb[1].mxu0 }
  0xe5   : > { %1379 = vtanh.f32 %v331_v15  ;;  %v1215_v18 = vmul.f32 -1.442695, %v331_v15 }
  0xe7   : > { %1381 = vpow2.f32 %v1215_v18 }
  0xef   : > { %v1380_v17 = vpop.eup %1379 }
  0xf0   : > { %345 = vrot.lane.b32.xlu0 %v1380_v17, %s1472_s6 }
  0xf1   : > { %v1382_v19 = vpop.eup %1381 }
  0xf2   : > { %v335_v20 = vadd.f32 1.0, %v1382_v19 }
  0xf4   : > { %1383 = vrcp.f32 %v335_v20 }
  0xfe   : > { %v1384_v21 = vpop.eup %1383 }
  0xff   : > { %v343_v25 = vmul.f32 %v1384_v21, %v341_v24 }
 0x162   : > { %v346_v22 = vpop.permute.xlu0 %345 }
 0x163   : > { %v348_v23 = vmul.f32 %v1384_v21, %v346_v22 }
 0x165   : > { %350 = vrot.lane.b32.xlu1 %v348_v23, %s1471_s27 }
 0x1d7   : > { %v351_v26 = vpop.permute.xlu1 %350 }
 0x1d8   : > { %v353_v27 = vadd.f32 %v351_v26, %v343_v25 }
 0x1da   : > { %1385 = vtanh.f32 %v353_v27 }
 0x1e4   : > { %v1386_v28 = vpop.eup %1385 }
 0x1e5   : > { %356 = vrot.lane.b32.xlu0 %v1386_v28, %s1473_s7 }
 0x1e9   : > { %364 = vperm.xlu0 %1377, %v1216_v29  }
 0x257   : > { %v357_v30 = vpop.permute.xlu0 %356 }
 0x258   : > { %v359_v31 = vmul.f32 %v1384_v21, %v357_v30 }
 0x25a   : > { %370 = vrot.lane.b32.xlu1 %v359_v31, %s1474_s8 }
 0x268   : > { %v365_v33 = vpop.permute.xlu0 %364 }
 0x269   : > { %v367_v34 = vmul.f32 %v1559_v9, %v365_v33 }
 0x26b   : > { %v368_v35 = vadd.f32 %v1565_v12, %v367_v34 }
 0x2cc   : > { %v371_v32 = vpop.permute.xlu1 %370 }
 0x2cd   : > { %1276 = vmatmul.mubr.msk.f32.vlgmr.msra.gmra.mrb[0].mxu1 %vm228_vm0, %v371_v32  ;;  %v1225_v32 = vld [vmem:[%s1547_s26 + $0x20] sm:$0xff] }
 0x2ce   : > { %1331 = vmatpush3.bf16.msra.mxu1 %v1526_v3  ;;  %1289 = vmatprep.mubr.msk.f32.mxu1 %vm1468_vm1, %v1469_v4 }
 0x2cf   : > { %1335 = vmatprep.subr.bf16.mxu1 %v1467_v2 }
 0x3a0   : > { %v440_v36 = vpop.f32.mrb[0].mxu1 }
 0x3a1   : > { %v444_v37 = vadd.f32 %v440_v36, %v368_v35  ;;  %v1277_v38 = vpop.f32.mrb[1].mxu1 }
 0x3a3   : > { %1387 = vtanh.f32 %v444_v37  ;;  %v1218_v40 = vmul.f32 -1.442695, %v444_v37 }
 0x3a5   : > { %1389 = vpow2.f32 %v1218_v40 }
 0x3ad   : > { %v1388_v39 = vpop.eup %1387 }
 0x3ae   : > { %454 = vrot.lane.b32.xlu1 %v1388_v39, %s1472_s6 }
 0x3af   : > { %v1390_v41 = vpop.eup %1389 }
 0x3b0   : > { %v448_v42 = vadd.f32 1.0, %v1390_v41 }
 0x3b2   : > { %1391 = vrcp.f32 %v448_v42 }
 0x3bc   : > { %v1392_v43 = vpop.eup %1391 }
 0x3bd   : > { %v452_v46 = vmul.f32 %v1392_v43, %v353_v27 }
 0x420   : > { %v455_v44 = vpop.permute.xlu1 %454 }
 0x421   : > { %v457_v45 = vmul.f32 %v1392_v43, %v455_v44 }
 0x423   : > { %459 = vrot.lane.b32.xlu0 %v457_v45, %s1471_s27 }
 0x495   : > { %v460_v47 = vpop.permute.xlu0 %459 }
 0x496   : > { %v462_v48 = vadd.f32 %v460_v47, %v452_v46 }
 0x498   : > { %1393 = vtanh.f32 %v462_v48 }
 0x4a2   : > { %v1394_v49 = vpop.eup %1393 }
 0x4a3   : > { %465 = vrot.lane.b32.xlu1 %v1394_v49, %s1473_s7 }
 0x4a7   : > { %473 = vperm.xlu1 %1378, %v1219_v50  }
 0x515   : > { %v466_v51 = vpop.permute.xlu1 %465 }
 0x516   : > { %v468_v52 = vmul.f32 %v1392_v43, %v466_v51 }
 0x518   : > { %479 = vrot.lane.b32.xlu0 %v468_v52, %s1474_s8 }
 0x526   : > { %v474_v54 = vpop.permute.xlu1 %473 }
 0x527   : > { %v476_v55 = vmul.f32 %v1559_v9, %v474_v54 }
 0x529   : > { %v477_v56 = vadd.f32 %v1565_v12, %v476_v55 }
 0x58a   : > { %v480_v53 = vpop.permute.xlu0 %479 }
 0x58b   : > { %1283 = vmatmul.mubr.msk.f32.vlgmr.msra.gmra.mrb[2].mxu0 %vm228_vm0, %v480_v53  ;;  %v1228_v53 = vld [vmem:[%s1547_s26 + $0x28] sm:$0xff] }
 0x58c   : > { %1334 = vmatpush3.bf16.msra.mxu0 %v1526_v3  ;;  %1296 = vmatprep.mubr.msk.f32.mxu0 %vm1468_vm1, %v1469_v4 }
 0x58d   : > { %1338 = vmatprep.subr.bf16.mxu0 %v1467_v2 }
 0x65e   : > { %v549_v57 = vpop.f32.mrb[2].mxu0 }
 0x65f   : > { %v553_v58 = vadd.f32 %v549_v57, %v477_v56  ;;  %v1284_v59 = vpop.f32.mrb[3].mxu0 }
 0x661   : > { %1395 = vtanh.f32 %v553_v58  ;;  %v1221_v61 = vmul.f32 -1.442695, %v553_v58 }
 0x663   : > { %1397 = vpow2.f32 %v1221_v61 }
 0x66b   : > { %v1396_v60 = vpop.eup %1395 }
 0x66c   : > { %563 = vrot.lane.b32.xlu0 %v1396_v60, %s1472_s6 }
 0x66d   : > { %v1398_v62 = vpop.eup %1397 }
 0x66e   : > { %v557_v63 = vadd.f32 1.0, %v1398_v62 }
 0x670   : > { %1399 = vrcp.f32 %v557_v63 }
 0x67a   : > { %v1400_v0 = vpop.eup %1399 }
 0x67b   : > { %v561_v6 = vmul.f32 %v1400_v0, %v462_v48 }
 0x6de   : > { %v564_v1 = vpop.permute.xlu0 %563 }
 0x6df   : > { %v566_v5 = vmul.f32 %v1400_v0, %v564_v1 }
 0x6e1   : > { %568 = vrot.lane.b32.xlu1 %v566_v5, %s1471_s27 }
 0x753   : > { %v569_v7 = vpop.permute.xlu1 %568 }
 0x754   : > { %v571_v8 = vadd.f32 %v569_v7, %v561_v6 }
 0x756   : > { %1401 = vtanh.f32 %v571_v8 }
 0x760   : > { %v1402_v10 = vpop.eup %1401 }
 0x761   : > { %574 = vrot.lane.b32.xlu0 %v1402_v10, %s1473_s7 }
 0x765   : > { %582 = vperm.xlu0 %1377, %v1222_v11  }
 0x7d3   : > { %v575_v13 = vpop.permute.xlu0 %574 }
 0x7d4   : > { %v577_v14 = vmul.f32 %v1400_v0, %v575_v13  ;;  %v1231_v13 = vld [vmem:[%s1547_s26 + $0x30] sm:$0xff] }
 0x7d6   : > { %588 = vrot.lane.b32.xlu1 %v577_v14, %s1474_s8 }
 0x7e4   : > { %v583_v16 = vpop.permute.xlu0 %582 }
 0x7e5   : > { %v585_v17 = vmul.f32 %v1559_v9, %v583_v16 }
 0x7e7   : > { %v586_v18 = vadd.f32 %v1565_v12, %v585_v17 }
 0x848   : > { %v589_v15 = vpop.permute.xlu1 %588 }
 0x849   : > { %1290 = vmatmul.mubr.msk.f32.vlgmr.msra.gmra.mrb[2].mxu1 %vm228_vm0, %v589_v15 }
 0x84a   : > { %1337 = vmatpush3.bf16.msra.mxu1 %v1526_v3  ;;  %1303 = vmatprep.mubr.msk.f32.mxu1 %vm1468_vm1, %v1469_v4 }
 0x84b   : > { %1341 = vmatprep.subr.bf16.mxu1 %v1467_v2 }
 0x91c   : > { %v658_v19 = vpop.f32.mrb[2].mxu1 }
 0x91d   : > { %v662_v20 = vadd.f32 %v658_v19, %v586_v18  ;;  %v1291_v21 = vpop.f32.mrb[3].mxu1 }
 0x91f   : > { %1403 = vtanh.f32 %v662_v20  ;;  %v1224_v23 = vmul.f32 -1.442695, %v662_v20 }
 0x921   : > { %1405 = vpow2.f32 %v1224_v23 }
 0x929   : > { %v1404_v22 = vpop.eup %1403 }
 0x92a   : > { %672 = vrot.lane.b32.xlu1 %v1404_v22, %s1472_s6 }
 0x92b   : > { %v1406_v24 = vpop.eup %1405 }
 0x92c   : > { %v666_v25 = vadd.f32 1.0, %v1406_v24 }
 0x92e   : > { %1407 = vrcp.f32 %v666_v25 }
 0x938   : > { %v1408_v26 = vpop.eup %1407 }
 0x939   : > { %v670_v28 = vmul.f32 %v1408_v26, %v571_v8 }
 0x99c   : > { %v673_v2 = vpop.permute.xlu1 %672 }
 0x99d   : > { %v675_v27 = vmul.f32 %v1408_v26, %v673_v2 }
 0x99f   : > { %677 = vrot.lane.b32.xlu0 %v675_v27, %s1471_s27 }
 0xa11   : > { %v678_v29 = vpop.permute.xlu0 %677 }
 0xa12   : > { %v680_v30 = vadd.f32 %v678_v29, %v670_v28 }
 0xa14   : > { %1409 = vtanh.f32 %v680_v30 }
 0xa1e   : > { %v1410_v31 = vpop.eup %1409 }
 0xa1f   : > { %683 = vrot.lane.b32.xlu1 %v1410_v31, %s1473_s7 }
 0xa23   : > { %691 = vperm.xlu1 %1378, %v1225_v32  }
 0xa91   : > { %v684_v33 = vpop.permute.xlu1 %683 }
 0xa92   : > { %v686_v34 = vmul.f32 %v1408_v26, %v684_v33  ;;  %v1234_v33 = vld [vmem:[%s1547_s26 + $0x38] sm:$0xff] }
 0xa94   : > { %697 = vrot.lane.b32.xlu0 %v686_v34, %s1474_s8 }
 0xaa2   : > { %v692_v36 = vpop.permute.xlu1 %691 }
 0xaa3   : > { %v694_v37 = vmul.f32 %v1559_v9, %v692_v36 }
 0xaa5   : > { %v695_v38 = vadd.f32 %v1565_v12, %v694_v37 }
 0xb06   : > { %v698_v35 = vpop.permute.xlu0 %697 }
 0xb07   : > { %1297 = vmatmul.mubr.msk.f32.vlgmr.msra.gmra.mrb[4].mxu0 %vm228_vm0, %v698_v35 }
 0xb08   : > { %1340 = vmatpush3.bf16.msra.mxu0 %v1526_v3  ;;  %1310 = vmatprep.mubr.msk.f32.mxu0 %vm1468_vm1, %v1469_v4 }
 0xbda   : > { %v767_v39 = vpop.f32.mrb[4].mxu0 }
 0xbdb   : > { %v771_v40 = vadd.f32 %v767_v39, %v695_v38  ;;  %v1298_v41 = vpop.f32.mrb[5].mxu0 }
 0xbdd   : > { %1411 = vtanh.f32 %v771_v40  ;;  %v1227_v43 = vmul.f32 -1.442695, %v771_v40 }
 0xbdf   : > { %1413 = vpow2.f32 %v1227_v43 }
 0xbe7   : > { %v1412_v42 = vpop.eup %1411 }
 0xbe8   : > { %781 = vrot.lane.b32.xlu0 %v1412_v42, %s1472_s6 }
 0xbe9   : > { %v1414_v44 = vpop.eup %1413 }
 0xbea   : > { %v775_v45 = vadd.f32 1.0, %v1414_v44 }
 0xbec   : > { %1415 = vrcp.f32 %v775_v45 }
 0xbf6   : > { %v1416_v46 = vpop.eup %1415 }
 0xbf7   : > { %v779_v49 = vmul.f32 %v1416_v46, %v680_v30 }
 0xc5a   : > { %v782_v47 = vpop.permute.xlu0 %781 }
 0xc5b   : > { %v784_v48 = vmul.f32 %v1416_v46, %v782_v47 }
 0xc5d   : > { %786 = vrot.lane.b32.xlu1 %v784_v48, %s1471_s27 }
 0xccf   : > { %v787_v50 = vpop.permute.xlu1 %786 }
 0xcd0   : > { %v789_v51 = vadd.f32 %v787_v50, %v779_v49 }
 0xcd2   : > { %1417 = vtanh.f32 %v789_v51 }
 0xcdc   : > { %v1418_v52 = vpop.eup %1417 }
 0xcdd   : > { %792 = vrot.lane.b32.xlu0 %v1418_v52, %s1473_s7 }
 0xce1   : > { %800 = vperm.xlu0 %1377, %v1228_v53  }
 0xd4f   : > { %v793_v54 = vpop.permute.xlu0 %792 }
 0xd50   : > { %v795_v55 = vmul.f32 %v1416_v46, %v793_v54 }
 0xd52   : > { %806 = vrot.lane.b32.xlu1 %v795_v55, %s1474_s8 }
 0xd60   : > { %v801_v57 = vpop.permute.xlu0 %800 }
 0xd61   : > { %v803_v58 = vmul.f32 %v1559_v9, %v801_v57 }
 0xd63   : > { %v804_v59 = vadd.f32 %v1565_v12, %v803_v58 }
 0xdc4   : > { %v807_v56 = vpop.permute.xlu1 %806 }
 0xdc5   : > { %1304 = vmatmul.mubr.msk.f32.vlgmr.msra.gmra.mrb[4].mxu1 %vm228_vm0, %v807_v56 }
 0xdc6   : > { %1343 = vmatpush3.bf16.msra.mxu1 %v1526_v3  ;;  %1317 = vmatprep.mubr.msk.f32.mxu1 %vm1468_vm1, %v1469_v4 }
 0xe98   : > { %v876_v60 = vpop.f32.mrb[4].mxu1 }
 0xe99   : > { %v880_v61 = vadd.f32 %v876_v60, %v804_v59  ;;  %v1305_v62 = vpop.f32.mrb[5].mxu1 }
 0xe9b   : > { %1419 = vtanh.f32 %v880_v61  ;;  %v1230_v0 = vmul.f32 -1.442695, %v880_v61 }
 0xe9d   : > { %1421 = vpow2.f32 %v1230_v0 }
 0xea5   : > { %v1420_v63 = vpop.eup %1419 }
 0xea6   : > { %890 = vrot.lane.b32.xlu1 %v1420_v63, %s1472_s6 }
 0xea7   : > { %v1422_v1 = vpop.eup %1421 }
 0xea8   : > { %v884_v3 = vadd.f32 1.0, %v1422_v1 }
 0xeaa   : > { %1423 = vrcp.f32 %v884_v3 }
 0xeb4   : > { %v1424_v5 = vpop.eup %1423 }
 0xeb5   : > { %v888_v7 = vmul.f32 %v1424_v5, %v789_v51 }
 0xf18   : > { %v891_v4 = vpop.permute.xlu1 %890 }
 0xf19   : > { %v893_v6 = vmul.f32 %v1424_v5, %v891_v4 }
 0xf1b   : > { %895 = vrot.lane.b32.xlu0 %v893_v6, %s1471_s27 }
 0xf8d   : > { %v896_v8 = vpop.permute.xlu0 %895 }
 0xf8e   : > { %v898_v10 = vadd.f32 %v896_v8, %v888_v7 }
 0xf90   : > { %1425 = vtanh.f32 %v898_v10 }
 0xf9a   : > { %v1426_v11 = vpop.eup %1425 }
 0xf9b   : > { %901 = vrot.lane.b32.xlu1 %v1426_v11, %s1473_s7 }
 0xf9f   : > { %909 = vperm.xlu1 %1378, %v1231_v13  }
0x100d   : > { %v902_v14 = vpop.permute.xlu1 %901 }
0x100e   : > { %v904_v15 = vmul.f32 %v1424_v5, %v902_v14 }
0x1010   : > { %915 = vrot.lane.b32.xlu0 %v904_v15, %s1474_s8 }
0x101e   : > { %v910_v17 = vpop.permute.xlu1 %909 }
0x101f   : > { %v912_v18 = vmul.f32 %v1559_v9, %v910_v17 }
0x1021   : > { %v913_v19 = vadd.f32 %v1565_v12, %v912_v18 }
0x1082   : > { %v916_v16 = vpop.permute.xlu0 %915 }
0x1083   : > { %1311 = vmatmul.mubr.msk.f32.vlgmr.msra.gmra.mrb[6].mxu0 %vm228_vm0, %v916_v16 }
0x1156   : > { %v985_v20 = vpop.f32.mrb[6].mxu0 }
0x1157   : > { %v989_v21 = vadd.f32 %v985_v20, %v913_v19  ;;  %v1312_v22 = vpop.f32.mrb[7].mxu0 }
0x1159   : > { %1427 = vtanh.f32 %v989_v21  ;;  %v1233_v24 = vmul.f32 -1.442695, %v989_v21 }
0x115b   : > { %1429 = vpow2.f32 %v1233_v24 }
0x1163   : > { %v1428_v23 = vpop.eup %1427 }
0x1164   : > { %999 = vrot.lane.b32.xlu0 %v1428_v23, %s1472_s6 }
0x1165   : > { %v1430_v25 = vpop.eup %1429 }
0x1166   : > { %v993_v26 = vadd.f32 1.0, %v1430_v25 }
0x1168   : > { %1431 = vrcp.f32 %v993_v26 }
0x1172   : > { %v1432_v2 = vpop.eup %1431 }
0x1173   : > { %v997_v29 = vmul.f32 %v1432_v2, %v898_v10 }
0x11d6   : > { %v1000_v27 = vpop.permute.xlu0 %999 }
0x11d7   : > { %v1002_v28 = vmul.f32 %v1432_v2, %v1000_v27 }
0x11d9   : > { %1004 = vrot.lane.b32.xlu1 %v1002_v28, %s1471_s27 }
0x124b   : > { %v1005_v30 = vpop.permute.xlu1 %1004 }
0x124c   : > { %v1007_v31 = vadd.f32 %v1005_v30, %v997_v29 }
0x124e   : > { %1433 = vtanh.f32 %v1007_v31 }
0x1258   : > { %v1434_v32 = vpop.eup %1433 }
0x1259   : > { %1010 = vrot.lane.b32.xlu0 %v1434_v32, %s1473_s7 }
0x125d   : > { %1018 = vperm.xlu0 %1377, %v1234_v33  }
0x12cb   : > { %v1011_v34 = vpop.permute.xlu0 %1010 }
0x12cc   : > { %v1013_v35 = vmul.f32 %v1432_v2, %v1011_v34 }
0x12ce   : > { %1024 = vrot.lane.b32.xlu1 %v1013_v35, %s1474_s8 }
0x12dc   : > { %v1019_v37 = vpop.permute.xlu0 %1018 }
0x12dd   : > { %v1021_v38 = vmul.f32 %v1559_v9, %v1019_v37 }
0x12df   : > { %v1022_v39 = vadd.f32 %v1565_v12, %v1021_v38 }
0x1340   : > { %v1025_v36 = vpop.permute.xlu1 %1024 }
0x1341   : > { %1318 = vmatmul.mubr.msk.f32.vlgmr.msra.gmra.mrb[6].mxu1 %vm228_vm0, %v1025_v36 }
0x1414   : > { %v1094_v40 = vpop.f32.mrb[6].mxu1 }
0x1415   : > { %v1098_v41 = vadd.f32 %v1094_v40, %v1022_v39  ;;  %v1319_v42 = vpop.f32.mrb[7].mxu1 }
0x1417   : > { %1435 = vtanh.f32 %v1098_v41  ;;  %v1236_v44 = vmul.f32 -1.442695, %v1098_v41 }
0x1419   : > { %1437 = vpow2.f32 %v1236_v44 }
0x1421   : > { %v1436_v43 = vpop.eup %1435 }
0x1422   : > { %1108 = vrot.lane.b32.xlu1 %v1436_v43, %s1472_s6 }
0x1423   : > { %v1438_v45 = vpop.eup %1437 }
0x1424   : > { %v1102_v46 = vadd.f32 1.0, %v1438_v45 }
0x1426   : > { %1439 = vrcp.f32 %v1102_v46 }
0x1430   : > { %v1440_v47 = vpop.eup %1439 }
0x1431   : > { %v1106_v9 = vmul.f32 %v1440_v47, %v1007_v31 }
0x1494   : > { %v1109_v48 = vpop.permute.xlu1 %1108 }
0x1495   : > { %v1111_v49 = vmul.f32 %v1440_v47, %v1109_v48 }
0x1497   : > { %1113 = vrot.lane.b32.xlu0 %v1111_v49, %s1471_s27 }
0x1509   : > { %v1114_v12 = vpop.permute.xlu0 %1113 }
0x150a   : > { %v1116_v50 = vadd.f32 %v1114_v12, %v1106_v9 }
0x150c   : > { %1441 = vtanh.f32 %v1116_v50 }
0x1516   : > { %v1442_v51 = vpop.eup %1441 }
0x1517   : > { %1119 = vrot.lane.b32.xlu1 %v1442_v51, %s1473_s7 }
0x151b   : > { %1129 = vrot.lane.b32.xlu1 %v1116_v50, %s1475_s9 }
0x1589   : > { %v1120_v52 = vpop.permute.xlu1 %1119 }
0x158a   : > { %v1122_v53 = vmul.f32 %v1440_v47, %v1120_v52 }
0x158c   : > { %1124 = vrot.lane.b32.xlu0 %v1122_v53, %s1474_s8 }
0x158d   : > { %v1130_v54 = vpop.permute.xlu1 %1129 }
0x158e   : > { %1132 = vst.msk [vmem:[#allocation3] sm:$0xff] %vm228_vm0, %v1130_v54 }
0x15fe   : > { %v1125_v55 = vpop.permute.xlu0 %1124 }
0x15ff   : > { %1127 = vst.msk [vmem:[#allocation2] sm:$0xff] %vm228_vm0, %v1125_v55  ;;  %1136 = vst.msk [vmem:[%s223_s13] sm:$0xff] %vm228_vm0, %v1125_v55 }
0x1600 PF: > { %s14_s17 = sadd.s32 1, %s1465_s17   ;;  %s1667_s15 = smov %s1461_s16 }
0x1601   : > { %p11_p5 = scmp.ge.s32.totalorder %s14_s17, 4   ;;  %s1668_s16 = smov %s1670_s18 }
0x1603   :  { %13 = sbr.rel (!%p11_p5) target bundleno = 2 (0x2), region = 81 }

</bundles_post_ra>
